<compile_context>
chip_gen: v7x
topology: tpu7x:2x2x1
jax: 0.10.0
libtpu: 0.0.40
codegen_flags: <defaults>
</compile_context>

<pallas_src>
import functools

import jax
import jax.numpy as jnp
from jax.experimental import pallas as pl
from jax.experimental.pallas import tpu as pltpu


def _round_up(v, m):
    return (v + m - 1) // m * m


def _pick_tile(padded, target):
    """Largest multiple of 128 that divides `padded` and is <= target (>= 128)."""
    best = 128
    units = padded // 128
    for d in range(1, units + 1):
        if units % d == 0 and 128 * d <= target:
            best = 128 * d
    return best


def _linear_bn_lrelu_kernel(x_ref, w_ref, o_ref, acc_ref, *,
                            tk, eps, negative_slope, inv_b, x_resident):
    # x_ref: (B, k_pad) if resident else (B, tk)
    # w_ref: (tk, tn) in (K, N) layout   o_ref: (B, tn)   acc_ref: (B, tn) f32 scratch
    k = pl.program_id(1)

    if x_resident:
        x_chunk = x_ref[:, pl.ds(pl.multiple_of(k * tk, 128), tk)]
    else:
        x_chunk = x_ref[...]

    # Linear (no bias) on the MXU, f32 accumulation.
    z = jnp.dot(x_chunk, w_ref[...], preferred_element_type=jnp.float32)

    @pl.when(k == 0)
    def _():
        acc_ref[...] = z          # direct assign: no extra zero-init pass over the accumulator

    @pl.when(k != 0)
    def _():
        acc_ref[...] += z

    @pl.when(k == pl.num_programs(1) - 1)
    def _():
        a = acc_ref[...]                                        # (B, tn) f32
        mean = jnp.sum(a, axis=0, keepdims=True) * inv_b        # (1, tn)
        c = a - mean
        var = jnp.sum(c * c, axis=0, keepdims=True) * inv_b     # biased batch variance (2-pass)
        z_hat = c * jax.lax.rsqrt(var + eps)                    # rsqrt -> EUP slot
        out = jnp.where(z_hat >= 0, z_hat, negative_slope * z_hat)
        o_ref[...] = out.astype(o_ref.dtype)


def linear_bn_leaky_relu(x, weight, *, eps=1e-4, negative_slope=0.01,
                         tn=512, tk=1024):
    """x: (B, in_features), weight: (out_features, in_features) (PyTorch layout)."""
    B, K = x.shape
    N, K2 = weight.shape
    assert K == K2, "weight/in_features mismatch"

    x_bytes = x.dtype.itemsize
    w_bytes = weight.dtype.itemsize
    o_bytes = x.dtype.itemsize

    k_pad = _round_up(K, 128)
    n_pad = _round_up(N, 128)

    # One-time layout fix-up: (N, K) -> (K, N) so the in-kernel matmul needs no transpose.
    w_t = weight.T
    if k_pad != K:
        # Zero-pad the contraction axis only (< 128 extra columns); padded K contributes 0.
        x = jnp.pad(x, ((0, 0), (0, k_pad - K)))
        w_t = jnp.pad(w_t, ((0, k_pad - K), (0, 0)))
    # N is intentionally NOT padded: the last weight/output block is partial; Pallas masks the
    # output write and the garbage columns never reach valid output features (BN is per-column).

    # Keep x resident in VMEM when it is small (single DMA, constant block index).
    x_resident = B * k_pad * x_bytes <= 8 * 1024 * 1024

    # Tile selection: divisors of the padded extents, shrunk until the VMEM estimate fits.
    vmem_budget = 48 * 1024 * 1024          # leave headroom under v7x's 64 MiB VMEM
    tgt_tk, tgt_tn = tk, tn
    while True:
        tk_sel = _pick_tile(k_pad, tgt_tk)
        tn_sel = _pick_tile(n_pad, tgt_tn)
        x_cost = (B * k_pad if x_resident else 2 * B * tk_sel) * x_bytes
        est = (x_cost
               + 2 * tk_sel * tn_sel * w_bytes       # double-buffered weight tile
               + 2 * B * tn_sel * o_bytes            # double-buffered output tile
               + B * tn_sel * 4)                     # f32 accumulator
        if est <= vmem_budget or (tk_sel == 128 and tn_sel == 128):
            break
        if tgt_tk >= tgt_tn and tgt_tk > 128:
            tgt_tk //= 2
        elif tgt_tn > 128:
            tgt_tn //= 2
        else:
            tgt_tk //= 2
    tk, tn = tk_sel, tn_sel
    grid_n = n_pad // tn
    grid_k = k_pad // tk
    vmem_limit = int(min(max(2 * est, 32 * 1024 * 1024), 64 * 1024 * 1024))

    if x_resident:
        # Constant block index -> DMA'd once and kept resident across all (n, k) steps.
        x_spec = pl.BlockSpec((B, k_pad), lambda n, k: (0, 0))
    else:
        x_spec = pl.BlockSpec((B, tk), lambda n, k: (0, k))

    kernel = functools.partial(
        _linear_bn_lrelu_kernel, tk=tk, eps=float(eps),
        negative_slope=float(negative_slope), inv_b=1.0 / B, x_resident=x_resident)

    return pl.pallas_call(
        kernel,
        out_shape=jax.ShapeDtypeStruct((B, N), x.dtype),
        grid_spec=pltpu.PrefetchScalarGridSpec(
            num_scalar_prefetch=0,
            grid=(grid_n, grid_k),                               # reduction axis last
            in_specs=[
                x_spec,
                pl.BlockSpec((tk, tn), lambda n, k: (k, n)),     # weight in (K, N) layout
            ],
            out_specs=pl.BlockSpec((B, tn), lambda n, k: (0, n)),
            scratch_shapes=[pltpu.VMEM((B, tn), jnp.float32)],
        ),
        compiler_params=pltpu.CompilerParams(
            dimension_semantics=("parallel", "arbitrary"),
            vmem_limit_bytes=vmem_limit),
    )(x, w_t)


def _reference(x, weight, eps=1e-4, negative_slope=0.01):
    z = x @ weight.T
    mean = z.mean(axis=0, keepdims=True)
    var = ((z - mean) ** 2).mean(axis=0, keepdims=True)
    z_hat = (z - mean) / jnp.sqrt(var + eps)
    return jnp.where(z_hat >= 0, z_hat, negative_slope * z_hat)


def _check(key, B, in_features, out_features, **kw):
    kx, kw_key = jax.random.split(key)
    x = jax.random.normal(kx, (B, in_features), dtype=jnp.float32)
    bound = 1.0 / jnp.sqrt(in_features)
    weight = jax.random.uniform(
        kw_key, (out_features, in_features), minval=-bound, maxval=bound,
        dtype=jnp.float32)

    out = jax.block_until_ready(linear_bn_leaky_relu(x, weight, **kw))
    ref = _reference(x, weight)
    assert out.shape == (B, out_features)
    assert jnp.allclose(out, ref, atol=2e-4, rtol=2e-3), "mismatch vs reference"


if __name__ == "__main__":
    key = jax.random.PRNGKey(0)
    k1, k2, k3 = jax.random.split(key, 3)

    # Small shape consistent with the module (single tile, partial N output block: 64 < 128).
    _check(k1, B=8, in_features=32, out_features=64)
    # Unaligned K/N: minimal (<128) padding of K only, partial last N block (320 within 384).
    _check(k2, B=16, in_features=640, out_features=320)
    # Multi-tile path: forces grid_k=4 ("arbitrary" accumulation) and grid_n=6 ("parallel").
    _check(k3, B=32, in_features=1024, out_features=768, tn=128, tk=256)

    print("KERNEL_OK")
</pallas_src>

<mosaic_0001>
module attributes {stable_mosaic.version = 11 : i64} {
  func.func @_linear_bn_lrelu_kernel(%arg0: i32, %arg1: i32, %arg2: memref<8x128xf32, #tpu.memory_space<vmem>>, %arg3: memref<128x128xf32, #tpu.memory_space<vmem>>, %arg4: memref<8x128xf32, #tpu.memory_space<vmem>>, %arg5: memref<8x128xf32, #tpu.memory_space<vmem>>) attributes {dimension_semantics = [#tpu.dimension_semantics<parallel>, #tpu.dimension_semantics<arbitrary>], iteration_bounds = array<i64: 1, 1>, scalar_prefetch = 0 : i64, scratch_operands = 1 : i64, tpu.core_type = #tpu.core_type<tc>, window_params = [{pipeline_mode = #tpu.pipeline_mode<synchronous>, transform_indices = @transform_0, window_bounds = array<i64: 8, 128>}, {transform_indices = @transform_1, window_bounds = array<i64: 128, 128>}, {transform_indices = @transform_2, window_bounds = array<i64: 8, 128>}]} {
    %c128_i32 = arith.constant 128 : i32
    %0 = arith.muli %arg1, %c128_i32 : i32
    %1 = tpu.assume_multiple %0, 128 : i32
    %c0 = arith.constant 0 : index
    %2 = arith.index_cast %1 : i32 to index
    %3 = vector.load %arg2[%c0, %2] : memref<8x128xf32, #tpu.memory_space<vmem>>, vector<8x128xf32>
    %c0_0 = arith.constant 0 : index
    %c0_1 = arith.constant 0 : index
    %4 = vector.load %arg3[%c0_0, %c0_1] : memref<128x128xf32, #tpu.memory_space<vmem>>, vector<128x128xf32>
    %cst = arith.constant dense<0.000000e+00> : vector<8x128xf32>
    %5 = tpu.matmul %3, %4, %cst {dimension_numbers = #tpu.dot_dimension_numbers<[1], [0], [0], [1], [0, 0, 1, 1], [], []>} : vector<8x128xf32>, vector<128x128xf32>, vector<8x128xf32> -> vector<8x128xf32>
    %c0_i32 = arith.constant 0 : i32
    %6 = arith.cmpi eq, %arg1, %c0_i32 : i32
    %7 = arith.extui %6 : i1 to i32
    %c0_i32_2 = arith.constant 0 : i32
    %8 = arith.cmpi ne, %7, %c0_i32_2 : i32
    scf.if %8 {
      %c0_7 = arith.constant 0 : index
      %c0_8 = arith.constant 0 : index
      %15 = vector.load %arg5[%c0_7, %c0_8] : memref<8x128xf32, #tpu.memory_space<vmem>>, vector<8x128xf32>
      tpu.vector_store %arg5[%c0_7, %c0_8], %5 {strides = array<i32>} : memref<8x128xf32, #tpu.memory_space<vmem>>, vector<8x128xf32>,
    } else {
    }
    %c0_i32_3 = arith.constant 0 : i32
    %9 = arith.cmpi ne, %arg1, %c0_i32_3 : i32
    %10 = arith.extui %9 : i1 to i32
    %c0_i32_4 = arith.constant 0 : i32
    %11 = arith.cmpi ne, %10, %c0_i32_4 : i32
    scf.if %11 {
      %c0_7 = arith.constant 0 : index
      %c0_8 = arith.constant 0 : index
      %15 = vector.load %arg5[%c0_7, %c0_8] : memref<8x128xf32, #tpu.memory_space<vmem>>, vector<8x128xf32>
      %16 = arith.addf %15, %5 : vector<8x128xf32>
      %c0_9 = arith.constant 0 : index
      %c0_10 = arith.constant 0 : index
      %17 = vector.load %arg5[%c0_9, %c0_10] : memref<8x128xf32, #tpu.memory_space<vmem>>, vector<8x128xf32>
      tpu.vector_store %arg5[%c0_9, %c0_10], %16 {strides = array<i32>} : memref<8x128xf32, #tpu.memory_space<vmem>>, vector<8x128xf32>,
    } else {
    }
    %c0_i32_5 = arith.constant 0 : i32
    %12 = arith.cmpi eq, %arg1, %c0_i32_5 : i32
    %13 = arith.extui %12 : i1 to i32
    %c0_i32_6 = arith.constant 0 : i32
    %14 = arith.cmpi ne, %13, %c0_i32_6 : i32
    scf.if %14 {
      %c0_7 = arith.constant 0 : index
      %c0_8 = arith.constant 0 : index
      %15 = vector.load %arg5[%c0_7, %c0_8] : memref<8x128xf32, #tpu.memory_space<vmem>>, vector<8x128xf32>
      %cst_9 = arith.constant dense<0.000000e+00> : vector<128xf32>
      %16 = vector.multi_reduction <add>, %15, %cst_9 [0] : vector<8x128xf32> to vector<128xf32>
      %17 = vector.shape_cast %16 : vector<128xf32> to vector<1x128xf32>
      %cst_10 = arith.constant 1.250000e-01 : f32
      %18 = vector.broadcast %cst_10 : f32 to vector<1x128xf32>
      %19 = arith.mulf %17, %18 : vector<1x128xf32>
      %20 = vector.broadcast %19 : vector<1x128xf32> to vector<8x128xf32>
      %21 = arith.subf %15, %20 : vector<8x128xf32>
      %22 = arith.mulf %21, %21 : vector<8x128xf32>
      %cst_11 = arith.constant dense<0.000000e+00> : vector<128xf32>
      %23 = vector.multi_reduction <add>, %22, %cst_11 [0] : vector<8x128xf32> to vector<128xf32>
      %24 = vector.shape_cast %23 : vector<128xf32> to vector<1x128xf32>
      %cst_12 = arith.constant 1.250000e-01 : f32
      %25 = vector.broadcast %cst_12 : f32 to vector<1x128xf32>
      %26 = arith.mulf %24, %25 : vector<1x128xf32>
      %cst_13 = arith.constant 9.99999974E-5 : f32
      %27 = vector.broadcast %cst_13 : f32 to vector<1x128xf32>
      %28 = arith.addf %26, %27 : vector<1x128xf32>
      %29 = math.rsqrt %28 : vector<1x128xf32>
      %30 = vector.broadcast %29 : vector<1x128xf32> to vector<8x128xf32>
      %31 = arith.mulf %21, %30 : vector<8x128xf32>
      %cst_14 = arith.constant 0.000000e+00 : f32
      %32 = vector.broadcast %cst_14 : f32 to vector<8x128xf32>
      %33 = arith.cmpf oge, %31, %32 : vector<8x128xf32>
      %cst_15 = arith.constant 0.00999999977 : f32
      %34 = vector.broadcast %cst_15 : f32 to vector<8x128xf32>
      %35 = arith.mulf %34, %31 : vector<8x128xf32>
      %36 = arith.select %33, %31, %35 : vector<8x128xi1>, vector<8x128xf32>
      %c0_16 = arith.constant 0 : index
      %c0_17 = arith.constant 0 : index
      %37 = vector.load %arg4[%c0_16, %c0_17] : memref<8x128xf32, #tpu.memory_space<vmem>>, vector<8x128xf32>
      tpu.vector_store %arg4[%c0_16, %c0_17], %36 {strides = array<i32>} : memref<8x128xf32, #tpu.memory_space<vmem>>, vector<8x128xf32>,
    } else {
    }
    return
  }
  func.func @transform_0(%arg0: i32, %arg1: i32) -> (i32, i32) {
    %c0_i32 = arith.constant 0 : i32
    %c0_i32_0 = arith.constant 0 : i32
    %c0_i32_1 = arith.constant 0 : i32
    return %c0_i32, %c0_i32_0 : i32, i32
  }
  func.func @transform_1(%arg0: i32, %arg1: i32) -> (i32, i32) {
    %c0_i32 = arith.constant 0 : i32
    return %arg1, %arg0 : i32, i32
  }
  func.func @transform_2(%arg0: i32, %arg1: i32) -> (i32, i32) {
    %c0_i32 = arith.constant 0 : i32
    %c0_i32_0 = arith.constant 0 : i32
    return %c0_i32, %arg0 : i32, i32
  }
}

</mosaic_0001>

<bundles_post_ra>
// kernel: tpu_custom_call.1
= control target key start
LH: loop header
LB: loop body
LE: loop exit
PB: predicated region body
PF: predicated region fallthrough
CT: control target
= control target key end

     0   :  { %v263_v3 = vmov 0.0|0.0   ;;  %vm264_vm0 = vmmov 0   ;;  %v265_v6 = vmov 0.0   ;;  %s345_s0 = inlined_call_operand.vmem [shape: f32[8,128], index: 0, kind: input, shape index: {}]   ;;  %s346_s1 = inlined_call_operand.vmem [shape: f32[128,64], index: 1, kind: input, shape index: {}]   ;;  %s347_s2 = inlined_call_operand.hbm [shape: f32[8,64], index: 2, kind: output, shape index: {}]  }
   0x1   :  { %v17_v0 = vld [vmem:[%s346_s1] sm:$0xff]  ;;  %v18_v1 = vld [vmem:[%s346_s1 + $0x8] sm:$0xff]  ;;  %v19_v2 = vld [vmem:[%s346_s1 + $0x10] sm:$0xff]  ;;  %209 = vmatprep.subr.bf16.mxu0 %v263_v3  ;;  %206 = vmatprep.mubr.msk.f32.mxu0 %vm264_vm0, %v265_v6 }
   0x2   :  { %v210_v4 = vpack.c.bf16 %v18_v1, %v17_v0  ;;  %v20_v5 = vld [vmem:[%s346_s1 + $0x18] sm:$0xff]  ;;  %v21_v8 = vld [vmem:[%s346_s1 + $0x20] sm:$0xff]  ;;  %v22_v9 = vld [vmem:[%s346_s1 + $0x28] sm:$0xff] }
   0x3   :  { %v213_v7 = vpack.c.bf16 %v20_v5, %v19_v2 }
   0x4   :  { %211 = vmatpush3.bf16.msra.mxu0 %v210_v4 }
   0x5   :  { %212 = vmatprep.subr.bf16.mxu0 %v263_v3 }
   0x6   :  { %7 = vsyncpa [#allocation4], 0  ;;  %v216_v10 = vpack.c.bf16 %v22_v9, %v21_v8  ;;  %v23_v11 = vld [vmem:[%s346_s1 + $0x30] sm:$0xff]  ;;  %v24_v12 = vld [vmem:[%s346_s1 + $0x38] sm:$0xff] }
   0x7   :  { %v219_v13 = vpack.c.bf16 %v24_v12, %v23_v11  ;;  %v25_v14 = vld [vmem:[%s346_s1 + $0x40] sm:$0xff]  ;;  %v26_v15 = vld [vmem:[%s346_s1 + $0x48] sm:$0xff]  ;;  %v27_v17 = vld [vmem:[%s346_s1 + $0x50] sm:$0xff] }
   0x8   :  { %214 = vmatpush3.bf16.msra.mxu0 %v213_v7  ;;  %v222_v16 = vpack.c.bf16 %v26_v15, %v25_v14  ;;  %v28_v18 = vld [vmem:[%s346_s1 + $0x58] sm:$0xff]  ;;  %v29_v20 = vld [vmem:[%s346_s1 + $0x60] sm:$0xff]  ;;  %v30_v21 = vld [vmem:[%s346_s1 + $0x68] sm:$0xff] }
   0x9   :  { %215 = vmatprep.subr.bf16.mxu0 %v263_v3  ;;  %v225_v19 = vpack.c.bf16 %v28_v18, %v27_v17  ;;  %v228_v22 = vpack.c.bf16 %v30_v21, %v29_v20  ;;  %v31_v23 = vld [vmem:[%s346_s1 + $0x70] sm:$0xff]  ;;  %v32_v24 = vld [vmem:[%s346_s1 + $0x78] sm:$0xff]  ;;  %v16_v26 = vld [vmem:[%s345_s0] sm:$0xff]  ;;  %s266_s0 = smov [#allocation3]  }
   0xa   :  { %v231_v25 = vpack.c.bf16 %v32_v24, %v31_v23  ;;  %s148_s1 = sshll.u32 %s266_s0, 4  ;;  %s149_s1 = int_to_ptr.vmem [resolvable:$true] %s148_s1 }
   0xb   :  { %s239_s15 = scalar_lea.vmem %s149_s1, 128  ;;  %p244_p1 = scmp.lt.s32.totalorder %s149_s1, %s149_s1 }
   0xc   :  { %217 = vmatpush3.bf16.msra.mxu0 %v216_v10  ;;  %p240_p0 = scmp.ne.s32.totalorder %s149_s1, %s239_s15  ;;  %p245_p2 = scmp.lt.s32.totalorder %s239_s15, %s239_s15 }
   0xd   :  { %218 = vmatprep.subr.bf16.mxu0 %v263_v3 }
   0xe   :  { %p246_p3 = por %p245_p2, %p244_p1 }
  0x10   :  { %220 = vmatpush3.bf16.msra.mxu0 %v219_v13  ;;  %p247_p4 = pnand %p246_p3, %p240_p0 }
  0x11   :  { %221 = vmatprep.subr.bf16.mxu0 %v263_v3 }
  0x14   :  { %223 = vmatpush3.bf16.msra.mxu0 %v222_v16 }
  0x15   :  { %224 = vmatprep.subr.bf16.mxu0 %v263_v3 }
  0x18   :  { %226 = vmatpush3.bf16.msra.mxu0 %v225_v19 }
  0x19   :  { %227 = vmatprep.subr.bf16.mxu0 %v263_v3 }
  0x1c   :  { %229 = vmatpush3.bf16.msra.mxu0 %v228_v22 }
  0x1d   :  { %230 = vmatprep.subr.bf16.mxu0 %v263_v3 }
  0x20   :  { %232 = vmatpush3.bf16.msra.mxu0 %v231_v25 }
  0x23   :  { %207 = vmatmul.mubr.f32.vlgmr.msra.gmra.mrb[0].mxu0 %v16_v26 }
  0xf6   :  { %v99_v27 = vpop.f32.mrb[0].mxu0 }
  0xf7   :  { %v119_v28 = vrot.slane %v99_v27, 4  ;;  %v208_v29 = vpop.f32.mrb[1].mxu0 }
  0xf9   :  { %v120_v30 = vadd.f32 %v119_v28, %v99_v27 }
  0xfb   :  { %v121_v31 = vrot.slane %v120_v30, 2 }
  0xfd   :  { %v122_v32 = vadd.f32 %v121_v31, %v120_v30 }
  0xff   :  { %v123_v33 = vrot.slane %v122_v32, 1 }
 0x101   :  { %v124_v34 = vadd.f32 %v123_v33, %v122_v32 }
 0x103   :  { %v125_v35 = vmul.f32 0.125, %v124_v34 }
 0x105   :  { %v126_v36 = vsub.f32 %v99_v27, %v125_v35 }
 0x107   :  { %v127_v37 = vmul.f32 %v126_v36, %v126_v36 }
 0x109   :  { %v128_v38 = vrot.slane %v127_v37, 4 }
 0x10b   :  { %v129_v39 = vadd.f32 %v128_v38, %v127_v37 }
 0x10d   :  { %v130_v40 = vrot.slane %v129_v39, 2 }
 0x10f   :  { %v131_v41 = vadd.f32 %v130_v40, %v129_v39 }
 0x111   :  { %v132_v42 = vrot.slane %v131_v41, 1 }
 0x113   :  { %v133_v43 = vadd.f32 %v132_v42, %v131_v41 }
 0x115   :  { %v134_v44 = vmul.f32 0.125, %v133_v43 }
 0x117   :  { %v135_v45 = vadd.f32 0.0001, %v134_v44 }
 0x119   :  { %237 = vrsqrt.f32 %v135_v45 }
 0x123   :  { %v238_v46 = vpop.eup %237 }
 0x124   :  { %v137_v47 = vmul.f32 %v238_v46, %v126_v36 }
 0x126   :  { %vm138_vm1 = vcmp.ge.f32.partialorder %v137_v47, 0.0  ;;  %v139_v48 = vmul.f32 0.01, %v137_v47 }
 0x128   :  { %v140_v49 = vsel %vm138_vm1, %v137_v47, %v139_v48 }
 0x129   :  { %141 = vst [vmem:[#allocation3] sm:$0xff] %v140_v49 }
 0x12a   :  { %250 = shalt.err (!%p247_p4)
}
 0x12b   :  { %s251_s18 = scalar_lea.hbm %s347_s2, 128 }
 0x12c   :  { %p252_p5 = scmp.ne.s32.totalorder %s347_s2, %s251_s18  ;;  %p255_p6 = scmp.lt.u32.totalorder %s251_s18, %s347_s2 }
 0x12e   :  { %p257_p7 = pnand %p255_p6, %p252_p5 }
 0x130   :  { %260 = shalt.err (!%p257_p7)
}
 0x131   :  { %151 = dma.vmem_to_hbm [thread:$0]  %s149_s1, 128, %s347_s2, [#allocation4]  }
 0x132   :  { %261 = dma.done.wait [#allocation4], 128  }
 0x133   :  { %262 = vsyncadd [#allocation4], 4294967168 }
 0x134   :  { %155 = vsyncpa [#allocation4], 1 }

</bundles_post_ra>
